<compile_context>
chip_gen: v5e
topology: v5e:2x2
jax: 0.10.0
libtpu: 0.0.40
codegen_flags: <defaults>
</compile_context>

<pallas_src>
import numpy as np
import jax
import jax.numpy as jnp
from jax import lax
from jax.experimental import pallas as pl
from jax.experimental.pallas import tpu as pltpu

LANES = 128


def _choose_block_rows(R, itemsize, align, target_bytes=2 << 20):
    """Pick a sublane-aligned block row count.

    ~2 MiB per input block (double-buffered ~4 MiB) amortizes the ~0.35 us
    per-grid-step overhead while staying inside every generation's default
    scoped-VMEM budget (16 MiB on v5e).  On large inputs the block is capped so
    the grid has >= 2 (up to 8) steps for megacore / v7x dual-TC sharding.
    """
    br = max(align, target_bytes // (LANES * itemsize))
    want_blocks = min(8, max(1, R // 1024))
    if want_blocks > 1:
        br = min(br, -(-R // want_blocks))
    br = -(-br // align) * align          # round up to sublane packing
    br = min(br, R)                       # R is already a multiple of `align`
    return br


def _make_wgan_kernel(gan_type, target_is_real, real_label_val, fake_label_val,
                      block_rows, num_blocks, n_valid):
    """Builds the kernel body.  gan_type / target / label values are static
    Python constants (module config / a bool flag), so branches resolve at
    trace time."""
    gan_type = gan_type.lower()
    target_is_real = bool(target_is_real)

    if gan_type == 'wgan-gp':
        # wgan_loss: -mean(x) if real else mean(x)  -> fold sign per element
        sign = -1.0 if target_is_real else 1.0

        def transform(x):
            return sign * x
    elif gan_type == 'lsgan':
        t = float(real_label_val if target_is_real else fake_label_val)

        def transform(x):
            d = x - t
            return d * d
    elif gan_type in ('gan', 'ragan'):
        t = float(real_label_val if target_is_real else fake_label_val)

        def transform(x):
            # Numerically-stable BCEWithLogitsLoss (matches PyTorch):
            #   max(x, 0) - x*t + log1p(exp(-|x|))
            return (jnp.maximum(x, 0.0) - x * t
                    + jnp.log1p(jnp.exp(-jnp.abs(x))))
    else:
        raise NotImplementedError(
            'GAN type [{:s}] is not found'.format(gan_type))

    block_cap = block_rows * LANES
    last_block = num_blocks - 1
    # Residual valid-element count inside the last block (Python ints -> no
    # int32 overflow even for >2^31-element tensors).
    rem = n_valid - last_block * block_cap
    needs_mask = (rem != block_cap)   # zero-padded tail and/or ragged edge block

    def kernel(x_ref, out_ref):
        # Native dtype streamed from HBM; widen on-core (VPU cast is free here).
        x = x_ref[...].astype(jnp.float32)
        elem = transform(x)

        if not needs_mask:
            # Exact fit: every element of every block is valid.
            out_ref[...] = jnp.sum(elem, axis=0, keepdims=True)
        else:
            b = pl.program_id(0)

            @pl.when(b != last_block)
            def _():
                out_ref[...] = jnp.sum(elem, axis=0, keepdims=True)

            @pl.when(b == last_block)
            def _():
                # Mask the zero-padded tail and the undefined overhang of a
                # ragged edge block (select, so NaN/Inf garbage is dropped).
                row = lax.broadcasted_iota(jnp.int32, (block_rows, LANES), 0)
                lane = lax.broadcasted_iota(jnp.int32, (block_rows, LANES), 1)
                in_block = row * LANES + lane      # < block_rows*128 << 2**31
                masked = jnp.where(in_block < rem, elem, 0.0)
                out_ref[...] = jnp.sum(masked, axis=0, keepdims=True)

    return kernel


def wgan_loss_pallas(x, target_is_real, gan_type='gan',
                     real_label_val=1.0, fake_label_val=0.0):
    """WGANLoss(gan_type, real_label_val, fake_label_val).forward(x, target_is_real)."""
    x = jnp.asarray(x)
    n = int(np.prod(x.shape))
    assert n > 0
    itemsize = x.dtype.itemsize
    align = max(8, 32 // itemsize)        # sublane packing: f32 8, bf16 16, 8-bit 32

    # Flatten to lane-dense 2D (R, 128) in the NATIVE dtype.  Pad only the tiny
    # tail (< align*128 elements) when n isn't lane/sublane aligned; padded
    # elements are masked in-kernel so the mean divisor stays exactly n.
    rows = -(-n // LANES)
    R = -(-rows // align) * align
    padded_n = R * LANES

    flat = x.reshape(-1)
    if padded_n != n:
        flat = jnp.pad(flat, (0, padded_n - n))
    x2 = flat.reshape(R, LANES)

    block_rows = _choose_block_rows(R, itemsize, align)
    num_blocks = -(-R // block_rows)      # last block may be ragged (masked)

    kernel = _make_wgan_kernel(gan_type, target_is_real,
                               float(real_label_val), float(fake_label_val),
                               block_rows, num_blocks, n)

    partials = pl.pallas_call(
        kernel,
        out_shape=jax.ShapeDtypeStruct((num_blocks, LANES), jnp.float32),
        grid=(num_blocks,),
        in_specs=[pl.BlockSpec((block_rows, LANES), lambda i: (i, 0))],
        out_specs=pl.BlockSpec((1, LANES), lambda i: (i, 0)),
        compiler_params=pltpu.CompilerParams(
            dimension_semantics=("parallel",)),
    )(x2)

    # Tiny final reduction + mean in JAX (keeps the grid axis fully parallel).
    return jnp.sum(partials) / n


def wgan_loss_reference(x, target_is_real, gan_type='gan',
                        real_label_val=1.0, fake_label_val=0.0):
    """Pure-JAX reference mirroring the PyTorch module exactly (f32 math)."""
    gan_type = gan_type.lower()
    x = jnp.asarray(x).astype(jnp.float32)
    if gan_type == 'wgan-gp':
        return -jnp.mean(x) if target_is_real else jnp.mean(x)
    t = real_label_val if target_is_real else fake_label_val
    if gan_type == 'lsgan':
        return jnp.mean((x - t) ** 2)
    if gan_type in ('gan', 'ragan'):
        return jnp.mean(jnp.maximum(x, 0.0) - x * t
                        + jnp.log1p(jnp.exp(-jnp.abs(x))))
    raise NotImplementedError(gan_type)


if __name__ == "__main__":
    key = jax.random.PRNGKey(0)
    k1, k2 = jax.random.split(key)
    # Discriminator-style output: (N, C, H, W) = (2, 4, 16, 16)
    x_f32 = jax.random.normal(k1, (2, 4, 16, 16), dtype=jnp.float32)
    x_bf16 = jax.random.normal(k2, (2, 4, 16, 16),
                               dtype=jnp.float32).astype(jnp.bfloat16)
    # Ragged size (1155 elements) to exercise the padded/masked edge block.
    x_rag = jax.random.normal(k1, (3, 5, 7, 11), dtype=jnp.float32)

    ok = True
    for name, x in (("f32", x_f32), ("bf16", x_bf16), ("f32_ragged", x_rag)):
        for gan_type in ('gan', 'ragan', 'lsgan', 'wgan-gp'):
            for target_is_real in (True, False):
                out = jax.block_until_ready(
                    wgan_loss_pallas(x, target_is_real, gan_type=gan_type))
                ref = jax.block_until_ready(
                    wgan_loss_reference(x, target_is_real, gan_type=gan_type))
                if not np.allclose(np.asarray(out, np.float32),
                                   np.asarray(ref, np.float32),
                                   atol=2e-5, rtol=2e-5):
                    ok = False
                    print("MISMATCH", name, gan_type, target_is_real,
                          float(out), float(ref))

    assert ok
    print("KERNEL_OK")
</pallas_src>

<mosaic_0001>
module attributes {stable_mosaic.version = 11 : i64} {
  func.func @kernel(%arg0: i32, %arg1: memref<16x128xf32, #tpu.memory_space<vmem>>, %arg2: memref<1x128xf32, #tpu.memory_space<vmem>>) attributes {dimension_semantics = [#tpu.dimension_semantics<parallel>], iteration_bounds = array<i64: 1>, scalar_prefetch = 0 : i64, scratch_operands = 0 : i64, tpu.core_type = #tpu.core_type<tc>, window_params = [{transform_indices = @transform_0, window_bounds = array<i64: 16, 128>}, {transform_indices = @transform_1, window_bounds = array<i64: 1, 128>}]} {
    %c0 = arith.constant 0 : index
    %c0_0 = arith.constant 0 : index
    %0 = vector.load %arg1[%c0, %c0_0] : memref<16x128xf32, #tpu.memory_space<vmem>>, vector<16x128xf32>
    %cst = arith.constant 0.000000e+00 : f32
    %1 = vector.broadcast %cst : f32 to vector<16x128xf32>
    %2 = arith.maximumf %0, %1 : vector<16x128xf32>
    %cst_1 = arith.constant 1.000000e+00 : f32
    %3 = vector.broadcast %cst_1 : f32 to vector<16x128xf32>
    %4 = arith.mulf %0, %3 : vector<16x128xf32>
    %5 = arith.subf %2, %4 : vector<16x128xf32>
    %6 = math.absf %0 : vector<16x128xf32>
    %cst_2 = arith.constant 0.000000e+00 : f32
    %7 = vector.broadcast %cst_2 : f32 to vector<16x128xf32>
    %8 = arith.subf %7, %6 : vector<16x128xf32>
    %9 = math.exp %8 : vector<16x128xf32>
    %10 = math.log1p %9 : vector<16x128xf32>
    %11 = arith.addf %5, %10 : vector<16x128xf32>
    %cst_3 = arith.constant dense<0.000000e+00> : vector<128xf32>
    %12 = vector.multi_reduction <add>, %11, %cst_3 [0] : vector<16x128xf32> to vector<128xf32>
    %13 = vector.shape_cast %12 : vector<128xf32> to vector<1x128xf32>
    %c0_4 = arith.constant 0 : index
    %c0_5 = arith.constant 0 : index
    %14 = vector.load %arg2[%c0_4, %c0_5] : memref<1x128xf32, #tpu.memory_space<vmem>>, vector<1x128xf32>
    tpu.vector_store %arg2[%c0_4, %c0_5], %13 {strides = array<i32>} : memref<1x128xf32, #tpu.memory_space<vmem>>, vector<1x128xf32>,
    return
  }
  func.func @transform_0(%arg0: i32) -> (i32, i32) {
    %c0_i32 = arith.constant 0 : i32
    %c0_i32_0 = arith.constant 0 : i32
    return %arg0, %c0_i32 : i32, i32
  }
  func.func @transform_1(%arg0: i32) -> (i32, i32) {
    %c0_i32 = arith.constant 0 : i32
    %c0_i32_0 = arith.constant 0 : i32
    return %arg0, %c0_i32 : i32, i32
  }
}

</mosaic_0001>

<bundles_post_ra>
// kernel: tpu_custom_call.1
= control target key start
LH: loop header
LB: loop body
LE: loop exit
PB: predicated region body
PF: predicated region fallthrough
CT: control target
= control target key end

     0   :  { %6 = vsyncpa [#allocation3], 0  ;;  %s168_s0 = inlined_call_operand.hbm [shape: f32[16,128], index: 0, kind: input, shape index: {}]   ;;  %s169_s1 = inlined_call_operand.hbm [shape: f32[1,128], index: 1, kind: output, shape index: {}]  }
   0x1   :  { %7 = vsyncpa [#allocation4], 0  ;;  %s12_s8 = sshll.u32 %s168_s0, 4  ;;  %s148_s9 = smov [#allocation2]   ;;  %s13_s8 = int_to_ptr.hbm [resolvable:$true] %s12_s8 }
   0x2   :  { %s14_s10 = sshll.u32 %s148_s9, 4  ;;  %s149_s11 = smov 128   ;;  %s15_s10 = int_to_ptr.vmem [resolvable:$true] %s14_s10 }
   0x3   :  { %s150_s12 = smov 8  }
   0x4   :  { %20 = dma.hbm_to_vmem [thread:$0]  %s13_s8, 256, %s15_s10, [#allocation3], %s149_s11, %s149_s11, %s150_s12  }
   0x5   :  { %144 = dma.done.wait [#allocation3], 256  }
   0x6   :  { %145 = vsyncadd [#allocation3], 4294967040  ;;  %v25_v0 = vld [vmem:[#allocation2] sm:$0xff]  ;;  %v26_v1 = vld [vmem:[#allocation2 + $0x8] sm:$0xff]  ;;  %s151_s0 = smov [#allocation5]   ;;  %s74_s16 = sshll.u32 %s169_s1, 4  ;;  %s75_s16 = int_to_ptr.hbm [resolvable:$true] %s74_s16 }
   0x7   :  { %v31_v2 = vand.u32 2147483647, %v25_v0  ;;  %v32_v3 = vand.u32 2147483647, %v26_v1  ;;  %v27_v15 = vmax.f32 %v25_v0, 0.0  ;;  %v28_v18 = vmax.f32 %v26_v1, 0.0 }
   0x8   :  { %s72_s13 = sshll.u32 %s151_s0, 4  ;;  %s73_s13 = int_to_ptr.vmem [resolvable:$true] %s72_s13 }
   0x9   :  { %v33_v4 = vsub.f32 0.0, %v31_v2  ;;  %v34_v5 = vsub.f32 0.0, %v32_v3  ;;  %v29_v22 = vsub.f32 %v27_v15, %v25_v0  ;;  %v30_v25 = vsub.f32 %v28_v18, %v26_v1 }
   0xb   :  { %v35_v6 = vmul.f32 1.442695, %v33_v4  ;;  %v37_v7 = vmul.f32 1.442695, %v34_v5 }
   0xd   :  { %88 = vpow2.f32 %v35_v6 }
   0xe   :  { %90 = vpow2.f32 %v37_v7 }
  0x13   :  { %v89_v8 = vpop.eup %88 }
  0x14   :  { %v91_v9 = vpop.eup %90  ;;  %v39_v10 = vadd.f32 1.0, %v89_v8  ;;  %v42_v11 = vmul.f32 -0.5, %v89_v8  ;;  %v45_v16 = vand.u32 2147483647, %v89_v8 }
  0x15   :  { %v48_v12 = vadd.f32 1.0, %v91_v9  ;;  %v51_v13 = vmul.f32 -0.5, %v91_v9  ;;  %v54_v19 = vand.u32 2147483647, %v91_v9 }
  0x16   :  { %92 = vlog2.f32 %v39_v10  ;;  %v43_v14 = vadd.f32 1.0, %v42_v11  ;;  %vm46_vm0 = vcmp.lt.f32.partialorder %v45_v16, 0.0004427343 }
  0x17   :  { %94 = vlog2.f32 %v48_v12  ;;  %v52_v17 = vadd.f32 1.0, %v51_v13  ;;  %vm55_vm1 = vcmp.lt.f32.partialorder %v54_v19, 0.0004427343 }
  0x18   :  { %v44_v20 = vmul.f32 %v89_v8, %v43_v14 }
  0x19   :  { %v53_v23 = vmul.f32 %v91_v9, %v52_v17 }
  0x1c   :  { %v93_v21 = vpop.eup %92 }
  0x1d   :  { %v95_v24 = vpop.eup %94  ;;  %v41_v26 = vmul.f32 0.6931472, %v93_v21 }
  0x1e   :  { %v50_v27 = vmul.f32 0.6931472, %v95_v24 }
  0x1f   :  { %v47_v28 = vsel %vm46_vm0, %v44_v20, %v41_v26 }
  0x20   :  { %v56_v29 = vsel %vm55_vm1, %v53_v23, %v50_v27  ;;  %v57_v30 = vadd.f32 %v47_v28, %v29_v22 }
  0x21   :  { %v58_v31 = vadd.f32 %v56_v29, %v30_v25 }
  0x23   :  { %v59_v32 = vadd.f32 %v58_v31, %v57_v30 }
  0x25   :  { %v60_v33 = vrot.slane %v59_v32, 4 }
  0x27   :  { %v61_v34 = vadd.f32 %v60_v33, %v59_v32 }
  0x29   :  { %v62_v35 = vrot.slane %v61_v34, 2 }
  0x2b   :  { %v63_v36 = vadd.f32 %v62_v35, %v61_v34 }
  0x2d   :  { %v64_v37 = vrot.slane %v63_v36, 1 }
  0x2f   :  { %v65_v38 = vadd.f32 %v64_v37, %v63_v36 }
  0x31   :  { %66 = vst [vmem:[#allocation5] sm:$0x1] %v65_v38 }
  0x32   :  { %77 = dma.vmem_to_hbm [thread:$0]  %s73_s13, 16, %s75_s16, [#allocation4]  }
  0x33   :  { %146 = dma.done.wait [#allocation4], 16  }
  0x34   :  { %147 = vsyncadd [#allocation4], 4294967280 }
  0x35   :  { %82 = vsyncpa [#allocation3], 1 }
  0x36   :  { %83 = vsyncpa [#allocation4], 1 }

</bundles_post_ra>
